<compile_context>
chip_gen: v5e
topology: v5e:2x2
jax: 0.10.0
libtpu: 0.0.40
codegen_flags: <defaults>
</compile_context>

<pallas_src>
import functools

import jax
import jax.numpy as jnp
import numpy as np
from jax.experimental import pallas as pl
from jax.experimental.pallas import tpu as pltpu

_PAD = 128  # lane-aligned zero pad on each side of the resident activation


# ----------------------------- Pallas kernel --------------------------------
def convsc_kernel(x0_ref, m_ref, w_ref, p_ref, o_ref, x_scr, *, W, pad):
    """One grid step == one Conv->SiLU->BN->(+x) layer; x stays in VMEM scratch.

    x0_ref : (N, C, HW)      original input (resident; loaded once)
    m_ref  : (8, R)          per-tap validity masks (non-center taps, resident)
    w_ref  : (n, C, 9*C)     ALL layers' conv weights, bf16, resident
    p_ref  : (n, C, 4)       ALL layers' [bias, gamma, beta, 0], f32, resident
    o_ref  : (N, C, HW)      final output (written on the last grid step only)
    x_scr  : (C, pad+R+pad)  resident activation, zero-padded on the lane axis
    """
    layer = pl.program_id(0)
    last = pl.num_programs(0) - 1
    N, C, HW = x0_ref.shape
    R = N * HW

    @pl.when(layer == 0)
    def _():
        # Zero only the two pad strips; the center is fully overwritten below.
        zeros_pad = jnp.zeros((C, pad), jnp.float32)
        x_scr[:, :pad] = zeros_pad
        x_scr[:, pad + R:] = zeros_pad
        # Build the lane-dense (C, R) layout from the (N, C, HW) input slabs
        # (this replaces the XLA-side NCHW -> (C, R) transpose).
        for n in range(N):
            x_scr[:, pad + n * HW:pad + (n + 1) * HW] = x0_ref[n]

    x = x_scr[:, pad:pad + R]                     # (C, R) current activation

    # In-kernel "im2col": 9 statically shifted slices of the padded resident
    # activation, masked at image/sample borders, stacked on sublanes -> (9C, R).
    taps = []
    mi = 0
    for dh in (-1, 0, 1):
        for dw in (-1, 0, 1):
            if dh == 0 and dw == 0:
                taps.append(x)                    # center tap: always valid
            else:
                start = pad + dh * W + dw
                taps.append(x_scr[:, start:start + R] * m_ref[mi:mi + 1, :])
                mi += 1
    patches = jnp.concatenate(taps, axis=0).astype(jnp.bfloat16)   # (9C, R)

    # Resident per-layer parameters (dynamic first-axis index; no DMA).
    w_l = w_ref[layer]                            # (C, 9C) bf16
    p_l = p_ref[layer]                            # (C, 4)  f32
    bias = p_l[:, 0:1]
    gamma = p_l[:, 1:2]
    beta = p_l[:, 2:3]

    # Conv2d(3x3, s=1, p=1) == one MXU matmul per layer (K = 9C), + bias.
    z = jnp.dot(w_l, patches, preferred_element_type=jnp.float32) + bias

    # SiLU (EUP sigmoid + VPU mul), f32.
    y = z * jax.nn.sigmoid(z)

    # BatchNorm2d (training mode): per-channel stats over N*H*W (lane axis),
    # biased variance, single-pass (sum & sum-of-squares issue concurrently).
    inv_r = 1.0 / R
    s1 = jnp.sum(y, axis=1, keepdims=True)                         # (C, 1)
    s2 = jnp.sum(y * y, axis=1, keepdims=True)                     # (C, 1)
    mean = s1 * inv_r
    var = s2 * inv_r - mean * mean
    scale = gamma * jax.lax.rsqrt(var + 1e-5)
    y = (y - mean) * scale + beta

    new_x = y + x                                 # per-layer residual

    @pl.when(layer < last)
    def _():
        x_scr[:, pad:pad + R] = new_x             # keep resident for next layer

    @pl.when(layer == last)
    def _():
        # ConvSc's final "+ x_", written back as (N, C, HW) per-sample slabs so
        # the wrapper only needs a free reshape (no transpose).
        for n in range(N):
            o_ref[n] = new_x[:, n * HW:(n + 1) * HW] + x0_ref[n]


# ------------------------------- wrapper -------------------------------------
def prepare_params(weights, biases, gammas, betas):
    """Stack per-layer params ONCE outside the per-call path.

    weights: list of HWIO (3,3,C,C).  Returns:
      w_all: (n, C, 9C) bf16, columns ordered (kh, kw, cin)
      p_all: (n, C, 4)  f32, lanes = [bias, gamma, beta, 0]
    """
    C = weights[0].shape[-1]
    w_all = jnp.stack([w.reshape(9 * C, C).T for w in weights]).astype(jnp.bfloat16)
    p_all = jnp.stack([
        jnp.stack([b, g, bb, jnp.zeros_like(b)], axis=-1)
        for b, g, bb in zip(biases, gammas, betas)
    ]).astype(jnp.float32)
    return w_all, p_all


@jax.jit
def convsc_forward(x_nchw, w_all, p_all):
    """ConvSc.forward.  x_nchw: (N, C, H, W) f32."""
    x = x_nchw.astype(jnp.float32)
    N, C, H, W = x.shape
    HW = H * W
    R = N * HW
    n_layers = w_all.shape[0]

    x_flat = x.reshape(N, C, HW)                  # free reshape, no transpose

    # 3x3 border-validity masks for the 8 non-center taps over the flattened
    # (n, h, w) lane axis.  Built from constants only -> XLA constant-folds this
    # into the executable; runtime cost is a single resident 16 KiB DMA.
    hh = jnp.arange(H).reshape(1, H, 1)
    ww = jnp.arange(W).reshape(1, 1, W)
    masks = []
    for dh in (-1, 0, 1):
        for dw in (-1, 0, 1):
            if dh == 0 and dw == 0:
                continue
            valid = ((hh + dh >= 0) & (hh + dh < H) &
                     (ww + dw >= 0) & (ww + dw < W))               # (1, H, W)
            masks.append(jnp.broadcast_to(valid, (N, H, W)).reshape(R))
    mask = jnp.stack(masks).astype(jnp.float32)                    # (8, R)

    kernel = functools.partial(convsc_kernel, W=W, pad=_PAD)

    out = pl.pallas_call(
        kernel,
        out_shape=jax.ShapeDtypeStruct((N, C, HW), jnp.float32),
        grid_spec=pltpu.PrefetchScalarGridSpec(
            num_scalar_prefetch=0,
            grid=(n_layers,),
            in_specs=[
                pl.BlockSpec((N, C, HW), lambda i: (0, 0, 0)),   # x0 (resident)
                pl.BlockSpec((8, R), lambda i: (0, 0)),          # tap masks (resident)
                pl.BlockSpec(w_all.shape, lambda i: (0, 0, 0)),  # all weights (resident)
                pl.BlockSpec(p_all.shape, lambda i: (0, 0, 0)),  # all bias/gamma/beta
            ],
            out_specs=pl.BlockSpec((N, C, HW), lambda i: (0, 0, 0)),
            scratch_shapes=[pltpu.VMEM((C, _PAD + R + _PAD), jnp.float32)],
        ),
        compiler_params=pltpu.CompilerParams(
            dimension_semantics=("arbitrary",),     # layers are sequential
            vmem_limit_bytes=32 * 1024 * 1024,      # fits v7x's smaller VMEM easily
        ),
    )(x_flat, mask, w_all, p_all)

    return out.reshape(N, C, H, W)                # free reshape back to NCHW


# ------------------------------ pure-JAX reference ---------------------------
def convsc_reference(x_nchw, weights, biases, gammas, betas):
    x = jnp.transpose(x_nchw, (0, 2, 3, 1)).astype(jnp.float32)
    x0 = x
    for w, b, g, beta in zip(weights, biases, gammas, betas):
        z = jax.lax.conv_general_dilated(
            x, w, (1, 1), "SAME",
            dimension_numbers=("NHWC", "HWIO", "NHWC"),
            precision=jax.lax.Precision.HIGHEST) + b.reshape(1, 1, 1, -1)
        z = z * jax.nn.sigmoid(z)
        mean = jnp.mean(z, axis=(0, 1, 2), keepdims=True)
        var = jnp.mean(jnp.square(z - mean), axis=(0, 1, 2), keepdims=True)
        z = (z - mean) * jax.lax.rsqrt(var + 1e-5)
        z = z * g.reshape(1, 1, 1, -1) + beta.reshape(1, 1, 1, -1)
        x = z + x
    return jnp.transpose(x + x0, (0, 3, 1, 2))


# ------------------------------------ main -----------------------------------
if __name__ == "__main__":
    key = jax.random.PRNGKey(0)
    N, C, H, W = 2, 8, 16, 16     # small NCHW input, c = 8 channels
    n_layers = 4                  # ConvSc default n=4 (e=1 -> all layers c->c)

    k_x, k_w, k_b = jax.random.split(key, 3)
    x_nchw = jax.random.normal(k_x, (N, C, H, W), jnp.float32)

    # Deterministic parameter init (shapes from Conv2d(C, C, 3, 1, 1) + BN(C)).
    fan_in, fan_out = C * 9, C * 9
    xavier_std = float(np.sqrt(2.0 / (fan_in + fan_out)))
    bias_bound = float(1.0 / np.sqrt(fan_in))
    w_keys = jax.random.split(k_w, n_layers)
    b_keys = jax.random.split(k_b, n_layers)
    weights = [xavier_std * jax.random.normal(w_keys[i], (3, 3, C, C), jnp.float32)
               for i in range(n_layers)]                                   # HWIO
    biases = [jax.random.uniform(b_keys[i], (C,), jnp.float32,
                                 -bias_bound, bias_bound)
              for i in range(n_layers)]
    gammas = [jnp.ones((C,), jnp.float32) for _ in range(n_layers)]        # BN weight
    betas = [jnp.zeros((C,), jnp.float32) for _ in range(n_layers)]        # BN bias
    # TODO(synk): BatchNorm running_mean/running_var momentum updates are training
    # bookkeeping and do not affect this forward output; not modeled.

    w_all, p_all = prepare_params(weights, biases, gammas, betas)

    out = convsc_forward(x_nchw, w_all, p_all)
    out = jax.block_until_ready(out)

    ref = convsc_reference(x_nchw, weights, biases, gammas, betas)
    np.testing.assert_allclose(np.asarray(out), np.asarray(ref),
                               rtol=5e-2, atol=5e-2)

    print("KERNEL_OK")
</pallas_src>

<mosaic_0001>
module attributes {stable_mosaic.version = 11 : i64} {
  func.func @convsc_kernel(%arg0: i32, %arg1: memref<2x8x256xf32, #tpu.memory_space<vmem>>, %arg2: memref<8x512xf32, #tpu.memory_space<vmem>>, %arg3: memref<4x8x72xbf16, #tpu.memory_space<vmem>>, %arg4: memref<4x8x4xf32, #tpu.memory_space<vmem>>, %arg5: memref<2x8x256xf32, #tpu.memory_space<vmem>>, %arg6: memref<8x768xf32, #tpu.memory_space<vmem>>) attributes {dimension_semantics = [#tpu.dimension_semantics<arbitrary>], iteration_bounds = array<i64: 4>, scalar_prefetch = 0 : i64, scratch_operands = 1 : i64, tpu.core_type = #tpu.core_type<tc>, window_params = [{pipeline_mode = #tpu.pipeline_mode<synchronous>, transform_indices = @transform_0, window_bounds = array<i64: 2, 8, 256>}, {pipeline_mode = #tpu.pipeline_mode<synchronous>, transform_indices = @transform_1, window_bounds = array<i64: 8, 512>}, {pipeline_mode = #tpu.pipeline_mode<synchronous>, transform_indices = @transform_2, window_bounds = array<i64: 4, 8, 72>}, {pipeline_mode = #tpu.pipeline_mode<synchronous>, transform_indices = @transform_3, window_bounds = array<i64: 4, 8, 4>}, {pipeline_mode = #tpu.pipeline_mode<synchronous>, transform_indices = @transform_4, window_bounds = array<i64: 2, 8, 256>}]} {
    %c0_i32 = arith.constant 0 : i32
    %0 = arith.cmpi eq, %arg0, %c0_i32 : i32
    %1 = arith.extui %0 : i1 to i32
    %c0_i32_0 = arith.constant 0 : i32
    %2 = arith.cmpi ne, %1, %c0_i32_0 : i32
    scf.if %2 {
      %cst_31 = arith.constant 0.000000e+00 : f32
      %84 = vector.broadcast %cst_31 : f32 to vector<8x128xf32>
      %c0_32 = arith.constant 0 : index
      %c0_33 = arith.constant 0 : index
      %85 = vector.load %arg6[%c0_32, %c0_33] : memref<8x768xf32, #tpu.memory_space<vmem>>, vector<8x128xf32>
      tpu.vector_store %arg6[%c0_32, %c0_33], %84 {strides = array<i32>} : memref<8x768xf32, #tpu.memory_space<vmem>>, vector<8x128xf32>,
      %c0_34 = arith.constant 0 : index
      %c640 = arith.constant 640 : index
      %86 = vector.load %arg6[%c0_34, %c640] : memref<8x768xf32, #tpu.memory_space<vmem>>, vector<8x128xf32>
      tpu.vector_store %arg6[%c0_34, %c640], %84 {strides = array<i32>} : memref<8x768xf32, #tpu.memory_space<vmem>>, vector<8x128xf32>,
      %c0_35 = arith.constant 0 : index
      %c0_36 = arith.constant 0 : index
      %c0_37 = arith.constant 0 : index
      %87 = vector.load %arg1[%c0_35, %c0_36, %c0_37] : memref<2x8x256xf32, #tpu.memory_space<vmem>>, vector<1x8x256xf32>
      %88 = vector.shape_cast %87 : vector<1x8x256xf32> to vector<8x256xf32>
      %c0_38 = arith.constant 0 : index
      %c128_39 = arith.constant 128 : index
      %89 = vector.load %arg6[%c0_38, %c128_39] : memref<8x768xf32, #tpu.memory_space<vmem>>, vector<8x256xf32>
      tpu.vector_store %arg6[%c0_38, %c128_39], %88 {strides = array<i32>} : memref<8x768xf32, #tpu.memory_space<vmem>>, vector<8x256xf32>,
      %c1_40 = arith.constant 1 : index
      %c0_41 = arith.constant 0 : index
      %c0_42 = arith.constant 0 : index
      %90 = vector.load %arg1[%c1_40, %c0_41, %c0_42] : memref<2x8x256xf32, #tpu.memory_space<vmem>>, vector<1x8x256xf32>
      %91 = vector.shape_cast %90 : vector<1x8x256xf32> to vector<8x256xf32>
      %c0_43 = arith.constant 0 : index
      %c384 = arith.constant 384 : index
      %92 = vector.load %arg6[%c0_43, %c384] : memref<8x768xf32, #tpu.memory_space<vmem>>, vector<8x256xf32>
      tpu.vector_store %arg6[%c0_43, %c384], %91 {strides = array<i32>} : memref<8x768xf32, #tpu.memory_space<vmem>>, vector<8x256xf32>,
    } else {
    }
    %c0 = arith.constant 0 : index
    %c128 = arith.constant 128 : index
    %3 = vector.load %arg6[%c0, %c128] : memref<8x768xf32, #tpu.memory_space<vmem>>, vector<8x512xf32>
    %c0_1 = arith.constant 0 : index
    %c111 = arith.constant 111 : index
    %4 = vector.load %arg6[%c0_1, %c111] : memref<8x768xf32, #tpu.memory_space<vmem>>, vector<8x512xf32>
    %c0_2 = arith.constant 0 : index
    %c0_3 = arith.constant 0 : index
    %5 = vector.load %arg2[%c0_2, %c0_3] : memref<8x512xf32, #tpu.memory_space<vmem>>, vector<1x512xf32>
    %6 = vector.broadcast %5 : vector<1x512xf32> to vector<8x512xf32>
    %7 = arith.mulf %4, %6 : vector<8x512xf32>
    %c0_4 = arith.constant 0 : index
    %c112 = arith.constant 112 : index
    %8 = vector.load %arg6[%c0_4, %c112] : memref<8x768xf32, #tpu.memory_space<vmem>>, vector<8x512xf32>
    %c1 = arith.constant 1 : index
    %c0_5 = arith.constant 0 : index
    %9 = vector.load %arg2[%c1, %c0_5] : memref<8x512xf32, #tpu.memory_space<vmem>>, vector<1x512xf32>
    %10 = vector.broadcast %9 : vector<1x512xf32> to vector<8x512xf32>
    %11 = arith.mulf %8, %10 : vector<8x512xf32>
    %c0_6 = arith.constant 0 : index
    %c113 = arith.constant 113 : index
    %12 = vector.load %arg6[%c0_6, %c113] : memref<8x768xf32, #tpu.memory_space<vmem>>, vector<8x512xf32>
    %c2 = arith.constant 2 : index
    %c0_7 = arith.constant 0 : index
    %13 = vector.load %arg2[%c2, %c0_7] : memref<8x512xf32, #tpu.memory_space<vmem>>, vector<1x512xf32>
    %14 = vector.broadcast %13 : vector<1x512xf32> to vector<8x512xf32>
    %15 = arith.mulf %12, %14 : vector<8x512xf32>
    %c0_8 = arith.constant 0 : index
    %c127 = arith.constant 127 : index
    %16 = vector.load %arg6[%c0_8, %c127] : memref<8x768xf32, #tpu.memory_space<vmem>>, vector<8x512xf32>
    %c3 = arith.constant 3 : index
    %c0_9 = arith.constant 0 : index
    %17 = vector.load %arg2[%c3, %c0_9] : memref<8x512xf32, #tpu.memory_space<vmem>>, vector<1x512xf32>
    %18 = vector.broadcast %17 : vector<1x512xf32> to vector<8x512xf32>
    %19 = arith.mulf %16, %18 : vector<8x512xf32>
    %c0_10 = arith.constant 0 : index
    %c129 = arith.constant 129 : index
    %20 = vector.load %arg6[%c0_10, %c129] : memref<8x768xf32, #tpu.memory_space<vmem>>, vector<8x512xf32>
    %c4 = arith.constant 4 : index
    %c0_11 = arith.constant 0 : index
    %21 = vector.load %arg2[%c4, %c0_11] : memref<8x512xf32, #tpu.memory_space<vmem>>, vector<1x512xf32>
    %22 = vector.broadcast %21 : vector<1x512xf32> to vector<8x512xf32>
    %23 = arith.mulf %20, %22 : vector<8x512xf32>
    %c0_12 = arith.constant 0 : index
    %c143 = arith.constant 143 : index
    %24 = vector.load %arg6[%c0_12, %c143] : memref<8x768xf32, #tpu.memory_space<vmem>>, vector<8x512xf32>
    %c5 = arith.constant 5 : index
    %c0_13 = arith.constant 0 : index
    %25 = vector.load %arg2[%c5, %c0_13] : memref<8x512xf32, #tpu.memory_space<vmem>>, vector<1x512xf32>
    %26 = vector.broadcast %25 : vector<1x512xf32> to vector<8x512xf32>
    %27 = arith.mulf %24, %26 : vector<8x512xf32>
    %c0_14 = arith.constant 0 : index
    %c144 = arith.constant 144 : index
    %28 = vector.load %arg6[%c0_14, %c144] : memref<8x768xf32, #tpu.memory_space<vmem>>, vector<8x512xf32>
    %c6 = arith.constant 6 : index
    %c0_15 = arith.constant 0 : index
    %29 = vector.load %arg2[%c6, %c0_15] : memref<8x512xf32, #tpu.memory_space<vmem>>, vector<1x512xf32>
    %30 = vector.broadcast %29 : vector<1x512xf32> to vector<8x512xf32>
    %31 = arith.mulf %28, %30 : vector<8x512xf32>
    %c0_16 = arith.constant 0 : index
    %c145 = arith.constant 145 : index
    %32 = vector.load %arg6[%c0_16, %c145] : memref<8x768xf32, #tpu.memory_space<vmem>>, vector<8x512xf32>
    %c7 = arith.constant 7 : index
    %c0_17 = arith.constant 0 : index
    %33 = vector.load %arg2[%c7, %c0_17] : memref<8x512xf32, #tpu.memory_space<vmem>>, vector<1x512xf32>
    %34 = vector.broadcast %33 : vector<1x512xf32> to vector<8x512xf32>
    %35 = arith.mulf %32, %34 : vector<8x512xf32>
    %36 = tpu.concatenate %7, %11, %15, %19, %3, %23, %27, %31, %35 in 0 : vector<8x512xf32>, vector<8x512xf32>, vector<8x512xf32>, vector<8x512xf32>, vector<8x512xf32>, vector<8x512xf32>, vector<8x512xf32>, vector<8x512xf32>, vector<8x512xf32> -> vector<72x512xf32>
    %37 = arith.truncf %36 : vector<72x512xf32> to vector<72x512xbf16>
    %38 = arith.index_cast %arg0 : i32 to index
    %c0_18 = arith.constant 0 : index
    %c0_19 = arith.constant 0 : index
    %39 = vector.load %arg3[%38, %c0_18, %c0_19] : memref<4x8x72xbf16, #tpu.memory_space<vmem>>, vector<1x8x72xbf16>
    %40 = vector.shape_cast %39 : vector<1x8x72xbf16> to vector<8x72xbf16>
    %41 = arith.index_cast %arg0 : i32 to index
    %c0_20 = arith.constant 0 : index
    %c0_21 = arith.constant 0 : index
    %42 = vector.load %arg4[%41, %c0_20, %c0_21] : memref<4x8x4xf32, #tpu.memory_space<vmem>>, vector<1x8x4xf32>
    %43 = vector.shape_cast %42 : vector<1x8x4xf32> to vector<8x4xf32>
    %44 = vector.extract_strided_slice %43 {offsets = [0, 0], sizes = [8, 1], strides = [1, 1]} : vector<8x4xf32> to vector<8x1xf32>
    %45 = vector.extract_strided_slice %43 {offsets = [0, 1], sizes = [8, 1], strides = [1, 1]} : vector<8x4xf32> to vector<8x1xf32>
    %46 = vector.extract_strided_slice %43 {offsets = [0, 2], sizes = [8, 1], strides = [1, 1]} : vector<8x4xf32> to vector<8x1xf32>
    %cst = arith.constant dense<0.000000e+00> : vector<8x512xf32>
    %47 = tpu.matmul %40, %37, %cst {dimension_numbers = #tpu.dot_dimension_numbers<[1], [0], [0], [1], [0, 0, 1, 1], [], []>} : vector<8x72xbf16>, vector<72x512xbf16>, vector<8x512xf32> -> vector<8x512xf32>
    %48 = vector.broadcast %44 : vector<8x1xf32> to vector<8x512xf32>
    %49 = arith.addf %47, %48 : vector<8x512xf32>
    %50 = arith.negf %49 : vector<8x512xf32>
    %51 = math.exp %50 : vector<8x512xf32>
    %cst_22 = arith.constant 1.000000e+00 : f32
    %52 = vector.broadcast %cst_22 : f32 to vector<8x512xf32>
    %53 = arith.addf %52, %51 : vector<8x512xf32>
    %54 = arith.divf %52, %53 : vector<8x512xf32>
    %55 = arith.mulf %49, %54 : vector<8x512xf32>
    %cst_23 = arith.constant dense<0.000000e+00> : vector<8xf32>
    %56 = vector.multi_reduction <add>, %55, %cst_23 [1] : vector<8x512xf32> to vector<8xf32>
    %57 = vector.shape_cast %56 : vector<8xf32> to vector<8x1xf32>
    %58 = arith.mulf %55, %55 : vector<8x512xf32>
    %cst_24 = arith.constant dense<0.000000e+00> : vector<8xf32>
    %59 = vector.multi_reduction <add>, %58, %cst_24 [1] : vector<8x512xf32> to vector<8xf32>
    %60 = vector.shape_cast %59 : vector<8xf32> to vector<8x1xf32>
    %cst_25 = arith.constant 0.001953125 : f32
    %61 = vector.broadcast %cst_25 : f32 to vector<8x1xf32>
    %62 = arith.mulf %57, %61 : vector<8x1xf32>
    %cst_26 = arith.constant 0.001953125 : f32
    %63 = vector.broadcast %cst_26 : f32 to vector<8x1xf32>
    %64 = arith.mulf %60, %63 : vector<8x1xf32>
    %65 = arith.mulf %62, %62 : vector<8x1xf32>
    %66 = arith.subf %64, %65 : vector<8x1xf32>
    %cst_27 = arith.constant 9.99999974E-6 : f32
    %67 = vector.broadcast %cst_27 : f32 to vector<8x1xf32>
    %68 = arith.addf %66, %67 : vector<8x1xf32>
    %69 = math.rsqrt %68 : vector<8x1xf32>
    %70 = arith.mulf %45, %69 : vector<8x1xf32>
    %71 = vector.broadcast %62 : vector<8x1xf32> to vector<8x512xf32>
    %72 = arith.subf %55, %71 : vector<8x512xf32>
    %73 = vector.broadcast %70 : vector<8x1xf32> to vector<8x512xf32>
    %74 = arith.mulf %72, %73 : vector<8x512xf32>
    %75 = vector.broadcast %46 : vector<8x1xf32> to vector<8x512xf32>
    %76 = arith.addf %74, %75 : vector<8x512xf32>
    %77 = arith.addf %76, %3 : vector<8x512xf32>
    %c3_i32 = arith.constant 3 : i32
    %78 = arith.cmpi slt, %arg0, %c3_i32 : i32
    %79 = arith.extui %78 : i1 to i32
    %c0_i32_28 = arith.constant 0 : i32
    %80 = arith.cmpi ne, %79, %c0_i32_28 : i32
    scf.if %80 {
      %c0_31 = arith.constant 0 : index
      %c128_32 = arith.constant 128 : index
      %84 = vector.load %arg6[%c0_31, %c128_32] : memref<8x768xf32, #tpu.memory_space<vmem>>, vector<8x512xf32>
      tpu.vector_store %arg6[%c0_31, %c128_32], %77 {strides = array<i32>} : memref<8x768xf32, #tpu.memory_space<vmem>>, vector<8x512xf32>,
    } else {
    }
    %c3_i32_29 = arith.constant 3 : i32
    %81 = arith.cmpi eq, %arg0, %c3_i32_29 : i32
    %82 = arith.extui %81 : i1 to i32
    %c0_i32_30 = arith.constant 0 : i32
    %83 = arith.cmpi ne, %82, %c0_i32_30 : i32
    scf.if %83 {
      %84 = vector.extract_strided_slice %77 {offsets = [0, 0], sizes = [8, 256], strides = [1, 1]} : vector<8x512xf32> to vector<8x256xf32>
      %c0_31 = arith.constant 0 : index
      %c0_32 = arith.constant 0 : index
      %c0_33 = arith.constant 0 : index
      %85 = vector.load %arg1[%c0_31, %c0_32, %c0_33] : memref<2x8x256xf32, #tpu.memory_space<vmem>>, vector<1x8x256xf32>
      %86 = vector.shape_cast %85 : vector<1x8x256xf32> to vector<8x256xf32>
      %87 = arith.addf %84, %86 : vector<8x256xf32>
      %c0_34 = arith.constant 0 : index
      %c0_35 = arith.constant 0 : index
      %c0_36 = arith.constant 0 : index
      %88 = vector.load %arg5[%c0_34, %c0_35, %c0_36] : memref<2x8x256xf32, #tpu.memory_space<vmem>>, vector<1x8x256xf32>
      %89 = vector.shape_cast %88 : vector<1x8x256xf32> to vector<8x256xf32>
      %90 = vector.shape_cast %87 : vector<8x256xf32> to vector<1x8x256xf32>
      tpu.vector_store %arg5[%c0_34, %c0_35, %c0_36], %90 {strides = array<i32>} : memref<2x8x256xf32, #tpu.memory_space<vmem>>, vector<1x8x256xf32>,
      %91 = vector.extract_strided_slice %77 {offsets = [0, 256], sizes = [8, 256], strides = [1, 1]} : vector<8x512xf32> to vector<8x256xf32>
      %c1_37 = arith.constant 1 : index
      %c0_38 = arith.constant 0 : index
      %c0_39 = arith.constant 0 : index
      %92 = vector.load %arg1[%c1_37, %c0_38, %c0_39] : memref<2x8x256xf32, #tpu.memory_space<vmem>>, vector<1x8x256xf32>
      %93 = vector.shape_cast %92 : vector<1x8x256xf32> to vector<8x256xf32>
      %94 = arith.addf %91, %93 : vector<8x256xf32>
      %c1_40 = arith.constant 1 : index
      %c0_41 = arith.constant 0 : index
      %c0_42 = arith.constant 0 : index
      %95 = vector.load %arg5[%c1_40, %c0_41, %c0_42] : memref<2x8x256xf32, #tpu.memory_space<vmem>>, vector<1x8x256xf32>
      %96 = vector.shape_cast %95 : vector<1x8x256xf32> to vector<8x256xf32>
      %97 = vector.shape_cast %94 : vector<8x256xf32> to vector<1x8x256xf32>
      tpu.vector_store %arg5[%c1_40, %c0_41, %c0_42], %97 {strides = array<i32>} : memref<2x8x256xf32, #tpu.memory_space<vmem>>, vector<1x8x256xf32>,
    } else {
    }
    return
  }
  func.func @transform_0(%arg0: i32) -> (i32, i32, i32) {
    %c0_i32 = arith.constant 0 : i32
    %c0_i32_0 = arith.constant 0 : i32
    %c0_i32_1 = arith.constant 0 : i32
    %c0_i32_2 = arith.constant 0 : i32
    return %c0_i32, %c0_i32_0, %c0_i32_1 : i32, i32, i32
  }
  func.func @transform_1(%arg0: i32) -> (i32, i32) {
    %c0_i32 = arith.constant 0 : i32
    %c0_i32_0 = arith.constant 0 : i32
    %c0_i32_1 = arith.constant 0 : i32
    return %c0_i32, %c0_i32_0 : i32, i32
  }
  func.func @transform_2(%arg0: i32) -> (i32, i32, i32) {
    %c0_i32 = arith.constant 0 : i32
    %c0_i32_0 = arith.constant 0 : i32
    %c0_i32_1 = arith.constant 0 : i32
    %c0_i32_2 = arith.constant 0 : i32
    return %c0_i32, %c0_i32_0, %c0_i32_1 : i32, i32, i32
  }
  func.func @transform_3(%arg0: i32) -> (i32, i32, i32) {
    %c0_i32 = arith.constant 0 : i32
    %c0_i32_0 = arith.constant 0 : i32
    %c0_i32_1 = arith.constant 0 : i32
    %c0_i32_2 = arith.constant 0 : i32
    return %c0_i32, %c0_i32_0, %c0_i32_1 : i32, i32, i32
  }
  func.func @transform_4(%arg0: i32) -> (i32, i32, i32) {
    %c0_i32 = arith.constant 0 : i32
    %c0_i32_0 = arith.constant 0 : i32
    %c0_i32_1 = arith.constant 0 : i32
    %c0_i32_2 = arith.constant 0 : i32
    return %c0_i32, %c0_i32_0, %c0_i32_1 : i32, i32, i32
  }
}

</mosaic_0001>

<bundles_post_ra>
// kernel: convsc_forward.1
= control target key start
LH: loop header
LB: loop body
LE: loop exit
PB: predicated region body
PF: predicated region fallthrough
CT: control target
= control target key end

     0   :  { %s1223_s15 = smov 0   ;;  %s1710_s0 = inlined_call_operand.vmem [shape: f32[2,8,256], index: 0, kind: input, shape index: {}]   ;;  %s1711_s1 = inlined_call_operand.vmem [shape: f32[8,512], index: 1, kind: input, shape index: {}]   ;;  %s1712_s2 = inlined_call_operand.vmem [shape: bf16[4,8,72], index: 2, kind: input, shape index: {}]   ;;  %s1713_s3 = inlined_call_operand.vmem [shape: f32[4,8,4], index: 3, kind: input, shape index: {}]   ;;  %s1714_s4 = inlined_call_operand.vmem [shape: f32[2,8,256], index: 4, kind: output, shape index: {}]  }
   0x1 LB: > { %s1229_s16 = sadd.s32 4294967295, %s1179_s15   ;;  %p1013_p0 = scmp.ge.s32.totalorder %s1179_s15, 1  ;;  %s1179_s15 = sphi %s1223_s15, %s14_s15  }
   0x2   : > { %p147_p1 = scmp.lt.s32.totalorder %s1179_s15, 5 }
   0x4   : > { %p148_p2 = pnand %p1013_p0, %p147_p1 }
   0x5   : > { %p1014_p3 = scmp.ne.s32.totalorder (!%p148_p2), %s1229_s16, 0 }
   0x6   : > { %151 = sbr.rel (%p148_p2) target bundleno = 941 (0x3ad), region = 36 }
   0xb   : > { %167 = sbr.rel (%p1014_p3) target bundleno = 23 (0x17), region = 40 }
  0x10   : > { %v170_v0 = vld [vmem:[%s1710_s0] sm:$0xff]  ;;  %v1181_v1 = vmov 0.0   ;;  %v171_v2 = vld [vmem:[%s1710_s0 + $0x8] sm:$0xff]  ;;  %v1015_v3 = vld [vmem:[%s1710_s0 + $0x10] sm:$0xff] }
  0x11   : > { %168 = vst [vmem:[#allocation2 + $0x20] sm:$0xff] %v1181_v1  ;;  %v1016_v4 = vld [vmem:[%s1710_s0 + $0x18] sm:$0xff] }
  0x12   : > { %169 = vst [vmem:[#allocation2 + $0x8] sm:$0xff] %v1181_v1 }
  0x13   : > { %172 = vst [vmem:[#allocation2 + $0x28] sm:$0xff] %v170_v0 }
  0x14   : > { %173 = vst [vmem:[#allocation2] sm:$0xff] %v171_v2 }
  0x15   : > { %177 = vst [vmem:[#allocation2 + $0x10] sm:$0xff] %v1015_v3 }
  0x16   : > { %178 = vst [vmem:[#allocation2 + $0x18] sm:$0xff] %v1016_v4 }
  0x17 PF: > { %v1023_v5 = vld [vmem:[%s1711_s1 + $0x7] ss:$8 sm:$0xf]  ;;  %v1021_v8 = vld [vmem:[%s1711_s1 + $0x5] ss:$8 sm:$0xf] }
  0x18   : > { %v396_v6 = vperm.slane %v1023_v5, 2  ;;  %v394_v7 = vperm.slane %v1023_v5, 0  ;;  %s1182_s29 = smov 17   ;;  %v336_v9 = vperm.slane %v1021_v8, 0  ;;  %s1183_s30 = smov 15   ;;  %v397_v10 = vperm.slane %v1023_v5, 3 }
  0x19   : > { %v395_v11 = vperm.slane %v1023_v5, 1  ;;  %v337_v12 = vperm.slane %v1021_v8, 1  ;;  %v1022_v13 = vld [vmem:[%s1711_s1 + $0x6] ss:$8 sm:$0xf]  ;;  %v339_v14 = vperm.slane %v1021_v8, 3 }
  0x1a   : > { %402 = vrot.lane.b32.xlu1 %v396_v6, %s1182_s29  ;;  %398 = vrot.lane.b32.xlu0 %v394_v7, %s1182_s29  ;;  %v338_v15 = vperm.slane %v1021_v8, 2  ;;  %v365_v16 = vperm.slane %v1022_v13, 0  ;;  %s1184_s7 = smov 16   ;;  %v367_v17 = vperm.slane %v1022_v13, 2  ;;  %v366_v18 = vperm.slane %v1022_v13, 1  ;;  %s1185_s10 = smov 1  }
  0x1b   : > { %340 = vrot.lane.b32.xlu2 %v336_v9, %s1183_s30  ;;  %v368_v19 = vperm.slane %v1022_v13, 3  ;;  %v1020_v20 = vld [vmem:[%s1711_s1 + $0x4] ss:$8 sm:$0xf]  ;;  %s1186_s13 = smov 113   ;;  %s1187_s18 = smov 127  }
  0x1c   : > { %v308_v21 = vperm.slane %v1020_v20, 1  ;;  %v307_v22 = vperm.slane %v1020_v20, 0  ;;  %v309_v23 = vperm.slane %v1020_v20, 2  ;;  %v1018_v24 = vld [vmem:[%s1711_s1 + $0x2] ss:$8 sm:$0xf] }
  0x1d   : > { %v310_v25 = vperm.slane %v1020_v20, 3  ;;  %v245_v26 = vperm.slane %v1018_v24, 1  ;;  %v246_v27 = vperm.slane %v1018_v24, 2  ;;  %v1019_v28 = vld [vmem:[%s1711_s1 + $0x3] ss:$8 sm:$0xf] }
  0x1e   : > { %v247_v29 = vperm.slane %v1018_v24, 3  ;;  %v274_v30 = vperm.slane %v1019_v28, 1  ;;  %v275_v31 = vperm.slane %v1019_v28, 2  ;;  %v1017_v32 = vld [vmem:[%s1711_s1 + $0x1] ss:$8 sm:$0xf] }
  0x1f   : > { %v276_v33 = vperm.slane %v1019_v28, 3  ;;  %v216_v34 = vperm.slane %v1017_v32, 1  ;;  %v217_v35 = vperm.slane %v1017_v32, 2  ;;  %s1188_s21 = smov 112   ;;  %v218_v36 = vperm.slane %v1017_v32, 3  ;;  %s1189_s24 = smov 111  }
  0x20   : > { %v244_v37 = vperm.slane %v1018_v24, 0  ;;  %v273_v38 = vperm.slane %v1019_v28, 0  ;;  %v215_v39 = vperm.slane %v1017_v32, 0  ;;  %v1281_v40 = vld [vmem:[%s1711_s1] ss:$8 sm:$0xf] }
  0x21   : > { %v187_v41 = vperm.slane %v1281_v40, 1  ;;  %v1286_v42 = vld [vmem:[#allocation2 + $0x28] sm:$0xff]  ;;  %v1288_v43 = vld [vmem:[#allocation2 + $0x18] sm:$0xff]  ;;  %s1190_s25 = smov 95   ;;  %s1191_s26 = smov 94   ;;  %vm406_vm0 = vcmask 138240  }
  0x22   : > { %404 = vrot.lane.b32.xlu1 %v397_v10, %s1182_s29  ;;  %400 = vrot.lane.b32.xlu0 %v395_v11, %s1182_s29  ;;  %v1072_v44 = vpack.i.bf16 %v1286_v42, %v1288_v43  ;;  %v1303_v54 = vld [vmem:[#allocation2] sm:$0xff]  ;;  %v1305_v55 = vld [vmem:[#allocation2 + $0x10] sm:$0xff]  ;;  %vm348_vm1 = vcmask 121856   ;;  %s1192_s27 = smov 96   ;;  %v188_v7 = vperm.slane %v1281_v40, 2  ;;  %vm377_vm2 = vcmask 130048  }
  0x23   : > { %342 = vrot.lane.b32.xlu2 %v337_v12, %s1183_s30  ;;  %v1067_v62 = vpack.i.bf16 %v1305_v55, %v1303_v54  ;;  %v1333_v9 = vld [vmem:[#allocation2 + $0x8] sm:$0xff]  ;;  %vm319_vm3 = vcmask 7168   ;;  %s1193_s28 = smov 110   ;;  %vm285_vm4 = vcmask 1039360   ;;  %vm227_vm5 = vcmask 916480   ;;  %s1024_s8 = sshll.u32 %s1229_s16, 2 }
  0x24   : > { %vm256_vm6 = vcmask 924672   ;;  %vm198_vm7 = vcmask 908288   ;;  %vm603_vm8 = vcmask 769024   ;;  %vm553_vm9 = vcmask 785408   ;;  %s639_s11 = scalar_lea.vmem %s1712_s2, %s1024_s8  ;;  %p1034_p4 = scmp.ge.s32.totalorder %s1229_s16, 3 }
  0x25   : > { %vm578_vm10 = vcmask 777216   ;;  %vm459_vm11 = vcmask 1031168   ;;  %vm528_vm12 = vcmask 900096   ;;  %vm765_vm13 = vcmask 1043456  }
  0x26   : > { %vm761_vm14 = vcmask 588800  }
  0x2a   : > { %346 = vrot.lane.b32.xlu1 %v339_v14, %s1183_s30  ;;  %344 = vrot.lane.b32.xlu0 %v338_v15, %s1183_s30  ;;  %s1194_s30 = smov 126  }
  0x2b   : > { %369 = vrot.lane.b32.xlu2 %v365_v16, %s1184_s7 }
  0x32   : > { %373 = vrot.lane.b32.xlu1 %v367_v17, %s1184_s7  ;;  %371 = vrot.lane.b32.xlu0 %v366_v18, %s1184_s7 }
  0x33   : > { %375 = vrot.lane.b32.xlu2 %v368_v19, %s1184_s7 }
  0x3a   : > { %313 = vrot.lane.b32.xlu1 %v308_v21, %s1185_s10  ;;  %311 = vrot.lane.b32.xlu0 %v307_v22, %s1185_s10 }
  0x3b   : > { %315 = vrot.lane.b32.xlu2 %v309_v23, %s1185_s10 }
  0x42   : > { %317 = vrot.lane.b32.xlu0 %v310_v25, %s1185_s10  ;;  %250 = vrot.lane.b32.xlu1 %v245_v26, %s1186_s13 }
  0x43   : > { %252 = vrot.lane.b32.xlu2 %v246_v27, %s1186_s13 }
  0x4a   : > { %254 = vrot.lane.b32.xlu0 %v247_v29, %s1186_s13  ;;  %279 = vrot.lane.b32.xlu1 %v274_v30, %s1187_s18  ;;  %v1354_v30 = vld [vmem:[#allocation2 + $0x20] sm:$0xff] }
  0x4b   : > { %281 = vrot.lane.b32.xlu2 %v275_v31, %s1187_s18 }
  0x52   : > { %283 = vrot.lane.b32.xlu0 %v276_v33, %s1187_s18  ;;  %221 = vrot.lane.b32.xlu1 %v216_v34, %s1188_s21 }
  0x53   : > { %223 = vrot.lane.b32.xlu2 %v217_v35, %s1188_s21 }
  0x5a   : > { %225 = vrot.lane.b32.xlu0 %v218_v36, %s1188_s21  ;;  %248 = vrot.lane.b32.xlu1 %v244_v37, %s1186_s13 }
  0x5b   : > { %277 = vrot.lane.b32.xlu2 %v273_v38, %s1187_s18 }
  0x62   : > { %219 = vrot.lane.b32.xlu0 %v215_v39, %s1188_s21  ;;  %192 = vrot.lane.b32.xlu1 %v187_v41, %s1189_s24 }
  0x63   : > { %1068 = vrot.lane.b32.xlu2 %v1067_v62, %s1189_s24 }
  0x6a   : > { %1073 = vrot.lane.b32.xlu0 %v1072_v44, %s1189_s24 }
  0x6b   : > { %194 = vrot.lane.b32.xlu2 %v188_v7, %s1189_s24 }
  0x75   : > { %v341_v45 = vpop.permute.xlu2 %340 }
  0x76   : > { %v357_v53 = vmul.f32 %v341_v45, %v1286_v42 }
  0x7d   : > { %v343_v46 = vpop.permute.xlu2 %342 }
  0x7e   : > { %v349_v0 = vsel %vm348_vm1, %v341_v45, %v343_v46 }
  0x7f   : > { %v358_v2 = vmul.f32 %v349_v0, %v1303_v54 }
  0x85   : > { %v1293_v47 = vpop.permute.xlu2 %369 }
  0x86   : > { %v386_v48 = vmul.f32 %v1293_v47, %v1286_v42 }
  0x88   : > { %568 = vrot.lane.b32.xlu1 %v386_v48, %s1190_s25 }
  0x8c   : > { %v1298_v49 = vpop.permute.xlu1 %402  ;;  %v399_v50 = vpop.permute.xlu0 %398 }
  0x8d   : > { %v415_v51 = vmul.f32 %v399_v50, %v1286_v42  ;;  %v376_v52 = vpop.permute.xlu2 %375 }
  0x8e   : > { %v390_v11 = vmul.f32 %v376_v52, %v1333_v9 }
  0x8f   : > { %593 = vrot.lane.b32.xlu0 %v415_v51, %s1191_s26 }
  0x94   : > { %v1307_v56 = vpop.permute.xlu1 %404  ;;  %v401_v57 = vpop.permute.xlu0 %400 }
  0x95   : > { %v407_v58 = vsel %vm406_vm0, %v399_v50, %v401_v57  ;;  %v408_v59 = vsel %vm406_vm0, %v401_v57, %v1298_v49  ;;  %v1318_v1 = vpop.permute.xlu2 %315  ;;  %v409_v44 = vsel %vm406_vm0, %v1298_v49, %v1307_v56  ;;  %v419_v48 = vmul.f32 %v1307_v56, %v1333_v9 }
  0x96   : > { %v416_v60 = vmul.f32 %v407_v58, %v1303_v54  ;;  %v417_v61 = vmul.f32 %v408_v59, %v1305_v55 }
  0x97   : > { %543 = vrot.lane.b32.xlu0 %v357_v53, %s1192_s27 }
  0x98   : > { %v1087_v63 = vpack.i.bf16 %v417_v61, %v416_v60 }
  0x9a   : > { %1088 = vrot.lane.b32.xlu1 %v1087_v63, %s1191_s26 }
  0x9c   : > { %v1323_v3 = vpop.permute.xlu1 %346  ;;  %v1325_v4 = vpop.permute.xlu0 %344 }
  0x9d   : > { %v350_v5 = vsel %vm348_vm1, %v343_v46, %v1325_v4  ;;  %v1335_v10 = vpop.permute.xlu2 %252  ;;  %v418_v46 = vmul.f32 %v409_v44, %v1288_v43  ;;  %v351_v56 = vsel %vm348_vm1, %v1325_v4, %v1323_v3  ;;  %v361_v63 = vmul.f32 %v1323_v3, %v1333_v9 }
  0x9e   : > { %v359_v6 = vmul.f32 %v350_v5, %v1305_v55  ;;  %v360_v0 = vmul.f32 %v351_v56, %v1288_v43 }
  0x9f   : > { %v1092_v60 = vpack.i.bf16 %v419_v48, %v418_v46 }
  0xa0   : > { %v1097_v8 = vpack.i.bf16 %v359_v6, %v358_v2  ;;  %v1102_v6 = vpack.i.bf16 %v361_v63, %v360_v0 }
  0xa2   : > { %1098 = vrot.lane.b32.xlu1 %v1097_v8, %s1192_s27 }
  0xa4   : > { %v1338_v12 = vpop.permute.xlu1 %373  ;;  %v1340_v13 = vpop.permute.xlu0 %371 }
  0xa5   : > { %v380_v14 = vsel %vm377_vm2, %v1338_v12, %v376_v52  ;;  %v282_v23 = vpop.permute.xlu2 %281  ;;  %v378_v4 = vsel %vm377_vm2, %v1293_v47, %v1340_v13  ;;  %v379_v7 = vsel %vm377_vm2, %v1340_v13, %v1338_v12 }
  0xa6   : > { %v389_v15 = vmul.f32 %v380_v14, %v1288_v43  ;;  %v388_v14 = vmul.f32 %v379_v7, %v1305_v55 }
  0xa8   : > { %v1112_v16 = vpack.i.bf16 %v390_v11, %v389_v15  ;;  %v387_v11 = vmul.f32 %v378_v4, %v1303_v54 }
  0xaa   : > { %1113 = vrot.lane.b32.xlu1 %v1112_v16, %s1190_s25  ;;  %v1107_v13 = vpack.i.bf16 %v388_v14, %v387_v11 }
  0xac   : > { %v314_v17 = vpop.permute.xlu1 %313  ;;  %v312_v18 = vpop.permute.xlu0 %311 }
  0xad   : > { %v321_v19 = vsel %vm319_vm3, %v314_v17, %v1318_v1  ;;  %v320_v20 = vsel %vm319_vm3, %v312_v18, %v314_v17  ;;  %v224_v27 = vpop.permute.xlu2 %223  ;;  %v328_v5 = vmul.f32 %v312_v18, %v1286_v42 }
  0xae   : > { %v330_v21 = vmul.f32 %v321_v19, %v1305_v55  ;;  %v329_v22 = vmul.f32 %v320_v20, %v1303_v54  ;;  %v189_v19 = vperm.slane %v1281_v40, 3 }
  0xb0   : > { %v1117_v24 = vpack.i.bf16 %v330_v21, %v329_v22 }
  0xb2   : > { %1118 = vrot.lane.b32.xlu1 %v1117_v24, %s1193_s28 }
  0xb4   : > { %v318_v25 = vpop.permute.xlu0 %317  ;;  %v1352_v26 = vpop.permute.xlu1 %250 }
  0xb5   : > { %v278_v31 = vpop.permute.xlu2 %277  ;;  %v322_v8 = vsel %vm319_vm3, %v1318_v1, %v318_v25  ;;  %v332_v15 = vmul.f32 %v318_v25, %v1333_v9  ;;  %v258_v16 = vsel %vm256_vm6, %v1352_v26, %v1335_v10 }
  0xb6   : > { %v294_v33 = vmul.f32 %v278_v31, %v1354_v30  ;;  %v331_v47 = vmul.f32 %v322_v8, %v1288_v43  ;;  %v267_v18 = vmul.f32 %v1303_v54, %v258_v16 }
  0xb8   : > { %v1122_v12 = vpack.i.bf16 %v332_v15, %v331_v47 }
  0xbc   : > { %v255_v28 = vpop.permute.xlu0 %254  ;;  %v280_v29 = vpop.permute.xlu1 %279 }
  0xbd   : > { %v287_v32 = vsel %vm285_vm4, %v280_v29, %v282_v23  ;;  %v269_v50 = vmul.f32 %v1288_v43, %v255_v28  ;;  %v286_v2 = vsel %vm285_vm4, %v278_v31, %v280_v29  ;;  %v259_v1 = vsel %vm256_vm6, %v1335_v10, %v255_v28 }
  0xbe   : > { %v296_v38 = vmul.f32 %v1303_v54, %v287_v32  ;;  %v295_v3 = vmul.f32 %v1286_v42, %v286_v2  ;;  %v268_v17 = vmul.f32 %v1305_v55, %v259_v1 }
  0xc0   : > { %v1127_v20 = vpack.i.bf16 %v268_v17, %v267_v18 }
  0xc4   : > { %v284_v34 = vpop.permute.xlu0 %283  ;;  %v1358_v35 = vpop.permute.xlu1 %221 }
  0xc5   : > { %v288_v36 = vsel %vm285_vm4, %v282_v23, %v284_v34  ;;  %v298_v37 = vmul.f32 %v1288_v43, %v284_v34  ;;  %v229_v51 = vsel %vm227_vm5, %v1358_v35, %v224_v27 }
  0xc6   : > { %v297_v39 = vmul.f32 %v1305_v55, %v288_v36  ;;  %v238_v58 = vmul.f32 %v1303_v54, %v229_v51  ;;  %v1440_v36 = vpop.permute.xlu2 %1068 }
  0xc7   : > { %v1082_v41 = vpack.i.bf16 %v294_v33, %v298_v37  ;;  %v1071_v37 = vunpack.i.h.bf16 %v1440_v36 }
  0xc8   : > { %v1132_v45 = vpack.i.bf16 %v297_v39, %v296_v38 }
  0xc9   : > { %1083 = vrot.lane.b32.xlu2 %v1082_v41, %s1188_s21 }
  0xca   : > { %1133 = vrot.lane.b32.xlu1 %v1132_v45, %s1188_s21 }
  0xcc   : > { %v226_v52 = vpop.permute.xlu0 %225  ;;  %v249_v53 = vpop.permute.xlu1 %248 }
  0xcd   : > { %v230_v49 = vsel %vm227_vm5, %v224_v27, %v226_v52  ;;  %v265_v57 = vmul.f32 %v249_v53, %v1354_v30  ;;  %v240_v21 = vmul.f32 %v1288_v43, %v226_v52  ;;  %v257_v23 = vsel %vm256_vm6, %v249_v53, %v1352_v26 }
  0xce   : > { %v239_v59 = vmul.f32 %v1305_v55, %v230_v49  ;;  %v266_v10 = vmul.f32 %v1286_v42, %v257_v23  ;;  %v186_v27 = vperm.slane %v1281_v40, 0  ;;  %v1451_v41 = vpop.permute.xlu2 %194 }
  0xcf   : > { %v1077_v61 = vpack.i.bf16 %v265_v57, %v269_v50 }
  0xd0   : > { %v1137_v62 = vpack.i.bf16 %v239_v59, %v238_v58 }
  0xd1   : > { %1093 = vrot.lane.b32.xlu2 %v1092_v60, %s1191_s26  ;;  %1078 = vrot.lane.b32.xlu0 %v1077_v61, %s1194_s30 }
  0xd2   : > { %1138 = vrot.lane.b32.xlu1 %v1137_v62, %s1187_s18 }
  0xd4   : > { %v220_v9 = vpop.permute.xlu0 %219  ;;  %v1430_v26 = vpop.permute.xlu1 %192 }
  0xd5   : > { %v236_v22 = vmul.f32 %v220_v9, %v1354_v30  ;;  %v228_v25 = vsel %vm227_vm5, %v220_v9, %v1358_v35 }
  0xd6   : > { %v237_v28 = vmul.f32 %v1286_v42, %v228_v25 }
  0xd7   : > { %v1142_v24 = vpack.i.bf16 %v236_v22, %v240_v21  ;;  %v1070_v22 = vunpack.i.l.bf16 %v1440_v36 }
  0xd9   : > { %1103 = vrot.lane.b32.xlu2 %v1102_v6, %s1192_s27  ;;  %518 = vrot.lane.b32.xlu0 %v328_v5, %s1193_s28 }
  0xda   : > { %476 = vrot.lane.b32.xlu1 %v295_v3, %s1188_s21 }
  0xdc   : > { %v1426_v29 = vpop.permute.xlu0 %1073 }
  0xdd   : > { %v1075_v40 = vunpack.i.l.bf16 %v1426_v29 }
  0xdf   : > { %v1449_v38 = vsel %vm198_vm7, %v1071_v37, %v1075_v40 }
  0xe1   : > { %1123 = vrot.lane.b32.xlu2 %v1122_v12, %s1193_s28  ;;  %1108 = vrot.lane.b32.xlu0 %v1107_v13, %s1190_s25 }
  0xe9   : > { %1128 = vrot.lane.b32.xlu2 %v1127_v20, %s1194_s30  ;;  %196 = vrot.lane.b32.xlu0 %v189_v19, %s1189_s24  ;;  %v1076_v19 = vunpack.i.h.bf16 %v1426_v29  ;;  %v200_v29 = vsel %vm198_vm7, %v1430_v26, %v1451_v41 }
  0xf1   : > { %1143 = vrot.lane.b32.xlu2 %v1142_v24, %s1187_s18  ;;  %451 = vrot.lane.b32.xlu0 %v266_v10, %s1194_s30  ;;  %v505_v10 = vsel %vm198_vm7, %v1076_v19, %v1070_v22 }
  0xf9   : > { %190 = vrot.lane.b32.xlu2 %v186_v27, %s1189_s24  ;;  %427 = vrot.lane.b32.xlu0 %v237_v28, %s1187_s18 }
  0xfa   : > { %v1433_v33 = vpop.permute.xlu1 %568 }
 0x101   : > { %v594_v31 = vpop.permute.xlu0 %593 }
 0x102   : > { %v633_v32 = vpack.c.bf16 %v594_v31, %v594_v31 }
 0x104   : > { %714 = vrot.lane.b32.xlu1 %v633_v32, %s1182_s29 }
 0x109   : > { %v1435_v34 = vpop.permute.xlu0 %543 }
 0x10a   : > { %v628_v35 = vpack.c.bf16 %v1433_v33, %v1435_v34 }
 0x10c   : > { %704 = vrot.lane.b32.xlu2 %v628_v35, %s1182_s29  ;;  %v1089_v39 = vpop.permute.xlu1 %1088 }
 0x10d   : > { %v1091_v48 = vunpack.i.h.bf16 %v1089_v39  ;;  %v1090_v49 = vunpack.i.l.bf16 %v1089_v39 }
 0x10f   : > { %v604_v58 = vsel %vm603_vm8, %v594_v31, %v1090_v49  ;;  %v605_v28 = vsel %vm603_vm8, %v1090_v49, %v1091_v48 }
 0x110   : > { %v634_v59 = vpack.c.bf16 %v604_v58, %v604_v58 }
 0x114   : > { %v1453_v44 = vpop.permute.xlu1 %1098 }
 0x115   : > { %v1101_v31 = vunpack.i.h.bf16 %v1453_v44  ;;  %v1100_v35 = vunpack.i.l.bf16 %v1453_v44 }
 0x11c   : > { %v1457_v51 = vpop.permute.xlu1 %1113 }
 0x11d   : > { %v1116_v62 = vunpack.i.h.bf16 %v1457_v51  ;;  %v1115_v63 = vunpack.i.l.bf16 %v1457_v51  ;;  %v555_v51 = vsel %vm553_vm9, %v1100_v35, %v1101_v31 }
 0x11f   : > { %v582_v5 = vsel %vm578_vm10, %v1115_v63, %v1116_v62  ;;  %v506_v62 = vsel %vm198_vm7, %v1070_v22, %v1071_v37 }
 0x123   : > { %v1455_v45 = vpop.permute.xlu2 %1083 }
 0x124   : > { %v1464_v60 = vpop.permute.xlu1 %1118  ;;  %v1085_v14 = vunpack.i.l.bf16 %v1455_v45 }
 0x125   : > { %v1120_v20 = vunpack.i.l.bf16 %v1464_v60  ;;  %v1121_v58 = vunpack.i.h.bf16 %v1464_v60 }
 0x12b   : > { %v1094_v46 = vpop.permute.xlu2 %1093 }
 0x12c   : > { %v1095_v50 = vunpack.i.l.bf16 %v1094_v46  ;;  %v1096_v17 = vunpack.i.h.bf16 %v1094_v46 }
 0x12e   : > { %v606_v52 = vsel %vm603_vm8, %v1091_v48, %v1095_v50  ;;  %v607_v21 = vsel %vm603_vm8, %v1095_v50, %v1096_v17  ;;  %v635_v50 = vpack.c.bf16 %v605_v28, %v605_v28 }
 0x12f   : > { %v636_v53 = vpack.c.bf16 %v606_v52, %v606_v52  ;;  %v637_v25 = vpack.c.bf16 %v607_v21, %v607_v21 }
 0x131   : > { %720 = vrot.lane.b32.xlu2 %v636_v53, %s1182_s29 }
 0x133   : > { %v1461_v57 = vpop.permute.xlu2 %1103 }
 0x134   : > { %v1106_v61 = vunpack.i.h.bf16 %v1461_v57  ;;  %v1105_v56 = vunpack.i.l.bf16 %v1461_v57 }
 0x136   : > { %v557_v2 = vsel %vm553_vm9, %v1105_v56, %v1106_v61  ;;  %v556_v61 = vsel %vm553_vm9, %v1101_v31, %v1105_v56 }
 0x137   : > { %v632_v4 = vpack.c.bf16 %v582_v5, %v557_v2 }
 0x139   : > { %716 = vrot.lane.b32.xlu2 %v634_v59, %s1182_s29 }
 0x13b   : > { %v1471_v0 = vpop.permute.xlu2 %1123 }
 0x13c   : > { %v1475_v6 = vpop.permute.xlu1 %1133 }
 0x13d   : > { %v1136_v7 = vunpack.i.h.bf16 %v1475_v6  ;;  %v1135_v8 = vunpack.i.l.bf16 %v1475_v6 }
 0x13f   : > { %v486_v16 = vsel %vm227_vm5, %v1135_v8, %v1136_v7 }
 0x141   : > { %712 = vrot.lane.b32.xlu2 %v632_v4, %s1182_s29  ;;  %v530_v4 = vsel %vm528_vm12, %v1120_v20, %v1121_v58 }
 0x142   : > { %v625_v36 = vpack.c.bf16 %v530_v4, %v506_v62 }
 0x143   : > { %v1480_v3 = vpop.permute.xlu2 %1128  ;;  %v1482_v11 = vpop.permute.xlu0 %1078 }
 0x144   : > { %v1131_v47 = vunpack.i.h.bf16 %v1480_v3  ;;  %v1130_v15 = vunpack.i.l.bf16 %v1480_v3  ;;  %v1080_v12 = vunpack.i.l.bf16 %v1482_v11  ;;  %v1522_v48 = vpop.permute.xlu1 %1138  ;;  %v1081_v22 = vunpack.i.h.bf16 %v1482_v11 }
 0x145   : > { %v1141_v2 = vunpack.i.h.bf16 %v1522_v48 }
 0x146   : > { %v622_v13 = vpack.c.bf16 %v1085_v14, %v1080_v12  ;;  %v462_v1 = vsel %vm459_vm11, %v1130_v15, %v1131_v47 }
 0x147   : > { %v620_v18 = vpack.c.bf16 %v486_v16, %v462_v1 }
 0x148   : > { %692 = vrot.lane.b32.xlu0 %v622_v13, %s1182_s29  ;;  %v1125_v13 = vunpack.i.l.bf16 %v1471_v0 }
 0x149   : > { %688 = vrot.lane.b32.xlu2 %v620_v18, %s1182_s29 }
 0x14a   : > { %v531_v37 = vsel %vm528_vm12, %v1121_v58, %v1125_v13 }
 0x14b   : > { %v519_v9 = vpop.permute.xlu0 %518  ;;  %v1519_v53 = vpop.permute.xlu2 %1143  ;;  %v626_v17 = vpack.c.bf16 %v531_v37, %v1449_v38 }
 0x14c   : > { %v529_v23 = vsel %vm528_vm12, %v519_v9, %v1120_v20  ;;  %v623_v24 = vpack.c.bf16 %v519_v9, %v1076_v19  ;;  %v1145_v49 = vunpack.i.l.bf16 %v1519_v53  ;;  %v554_v19 = vsel %vm553_vm9, %v1435_v34, %v1100_v35 }
 0x14d   : > { %v624_v27 = vpack.c.bf16 %v529_v23, %v505_v10  ;;  %v1140_v34 = vunpack.i.l.bf16 %v1522_v48  ;;  %v477_v23 = vpop.permute.xlu1 %476 }
 0x14e   : > { %694 = vrot.lane.b32.xlu1 %v623_v24, %s1182_s29  ;;  %v438_v56 = vsel %vm285_vm4, %v1141_v2, %v1145_v49  ;;  %v1086_v24 = vunpack.i.h.bf16 %v1455_v45  ;;  %v485_v45 = vsel %vm227_vm5, %v477_v23, %v1135_v8 }
 0x150   : > { %722 = vrot.lane.b32.xlu0 %v637_v25, %s1182_s29 }
 0x151   : > { %696 = vrot.lane.b32.xlu2 %v624_v27, %s1182_s29 }
 0x153   : > { %v1109_v32 = vpop.permute.xlu0 %1108  ;;  %v191_v11 = vpop.permute.xlu2 %190 }
 0x154   : > { %v1111_v39 = vunpack.i.h.bf16 %v1109_v32  ;;  %v1110_v46 = vunpack.i.l.bf16 %v1109_v32  ;;  %v207_v28 = vmul.f32 %v191_v11, %v1354_v30  ;;  %v199_v3 = vsel %vm198_vm7, %v191_v11, %v1430_v26 }
 0x156   : > { %718 = vrot.lane.b32.xlu1 %v635_v50, %s1182_s29  ;;  %v580_v52 = vsel %vm578_vm10, %v1110_v46, %v1111_v39  ;;  %v581_v44 = vsel %vm578_vm10, %v1111_v39, %v1115_v63  ;;  %v579_v18 = vsel %vm578_vm10, %v1433_v33, %v1110_v46  ;;  %v463_v33 = vsel %vm459_vm11, %v1131_v47, %v1080_v12 }
 0x157   : > { %v630_v57 = vpack.c.bf16 %v580_v52, %v555_v51  ;;  %v631_v5 = vpack.c.bf16 %v581_v44, %v556_v61  ;;  %v629_v9 = vpack.c.bf16 %v579_v18, %v554_v19  ;;  %v437_v47 = vsel %vm285_vm4, %v1140_v34, %v1141_v2 }
 0x158   : > { %v209_v12 = vmul.f32 %v1303_v54, %v200_v29  ;;  %v1146_v54 = vunpack.i.h.bf16 %v1519_v53  ;;  %v208_v39 = vmul.f32 %v1286_v42, %v199_v3  ;;  %v1195_v19 = vmov 0  }
 0x159   : > { %708 = vrot.lane.b32.xlu0 %v630_v57, %s1182_s29  ;;  %1147 = vset.pattern.permute.xlu2 %v1195_v19 }
 0x15b   : > { %v197_v59 = vpop.permute.xlu0 %196 }
 0x15c   : > { %v201_v60 = vsel %vm198_vm7, %v1451_v41, %v197_v59  ;;  %v211_v16 = vmul.f32 %v1288_v43, %v197_v59 }
 0x15d   : > { %v210_v63 = vmul.f32 %v1305_v55, %v201_v60  ;;  %v1126_v55 = vunpack.i.h.bf16 %v1471_v0  ;;  %v487_v0 = vsel %vm227_vm5, %v1136_v7, %v1085_v14  ;;  %v615_v7 = vpack.c.bf16 %v437_v47, %v209_v12  ;;  %v640_v12 = vld [vmem:[%s639_s11] sm:$0xf] }
 0x15e   : > { %710 = vrot.lane.b32.xlu1 %v631_v5, %s1182_s29  ;;  %v617_v20 = vpack.c.bf16 %v1145_v49, %v211_v16  ;;  %v621_v21 = vpack.c.bf16 %v487_v0, %v463_v33  ;;  %v484_v14 = vsel %vm227_vm5, %v1086_v24, %v477_v23 }
 0x15f   : > { %v616_v1 = vpack.c.bf16 %v438_v56, %v210_v63  ;;  %v532_v43 = vsel %vm528_vm12, %v1125_v13, %v1126_v55 }
 0x160   : > { %v627_v38 = vpack.c.bf16 %v532_v43, %v1075_v40 }
 0x161   : > { %680 = vrot.lane.b32.xlu2 %v616_v1, %s1182_s29  ;;  %698 = vrot.lane.b32.xlu0 %v625_v36, %s1182_s29 }
 0x163   : > { %v452_v40 = vpop.permute.xlu0 %451 }
 0x164   : > { %v460_v10 = vsel %vm459_vm11, %v1081_v22, %v452_v40  ;;  %v461_v25 = vsel %vm459_vm11, %v452_v40, %v1130_v15 }
 0x165   : > { %v618_v41 = vpack.c.bf16 %v484_v14, %v460_v10  ;;  %v619_v31 = vpack.c.bf16 %v485_v45, %v461_v25 }
 0x166   : > { %700 = vrot.lane.b32.xlu1 %v626_v17, %s1182_s29  ;;  %v705_v6 = vpop.permute.xlu2 %704 }
 0x169   : > { %682 = vrot.lane.b32.xlu2 %v617_v20, %s1182_s29  ;;  %706 = vrot.lane.b32.xlu0 %v629_v9, %s1182_s29 }
 0x16b   : > { %v428_v27 = vpop.permute.xlu0 %427 }
 0x16c   : > { %v435_v32 = vsel %vm285_vm4, %v1146_v54, %v428_v27  ;;  %v436_v35 = vsel %vm285_vm4, %v428_v27, %v1140_v34 }
 0x16d   : > { %v613_v15 = vpack.c.bf16 %v435_v32, %v207_v28  ;;  %v614_v46 = vpack.c.bf16 %v436_v35, %v208_v39 }
 0x16e   : > { %702 = vrot.lane.b32.xlu1 %v627_v38, %s1182_s29 }
 0x171   : > { %690 = vrot.lane.b32.xlu0 %v621_v21, %s1182_s29 }
 0x176   : > { %678 = vrot.lane.b32.xlu1 %v615_v7, %s1182_s29  ;;  %v715_v8 = vpop.permute.xlu1 %714 }
 0x179   : > { %684 = vrot.lane.b32.xlu0 %v618_v41, %s1182_s29 }
 0x17e   : > { %686 = vrot.lane.b32.xlu1 %v619_v31, %s1182_s29 }
 0x181   : > { %674 = vrot.lane.b32.xlu0 %v613_v15, %s1182_s29 }
 0x186   : > { %676 = vrot.lane.b32.xlu1 %v614_v46, %s1182_s29  ;;  %s1025_s29 = sshll.u32 %s1229_s16, 3 }
 0x187   : > { %s642_s7 = scalar_lea.vmem %s1713_s3, %s1025_s29 }
 0x188   : > { %v1612_v55 = vld [vmem:[%s642_s7] sm:$0xff] }
 0x189   : > { %646 = vperm.xlu2 %1147, %v1612_v55  }
 0x18b   : > { %v721_v30 = vpop.permute.xlu2 %720 }
 0x193   : > { %v717_v50 = vpop.permute.xlu2 %716 }
 0x194   : > { %v741_v51 = vsel %vm406_vm0, %v715_v8, %v717_v50 }
 0x195   : > { %v767_v52 = vsel %vm765_vm13, %v741_v51, 0 }
 0x196   : > { %781 = vmatpush.bf16.msra.mxu0 %v767_v52 }
 0x19b   : > { %v713_v53 = vpop.permute.xlu2 %712 }
 0x1a3   : > { %v689_v61 = vpop.permute.xlu2 %688 }
 0x1ab   : > { %v697_v56 = vpop.permute.xlu2 %696 }
 0x1ba   : > { %v693_v26 = vpop.permute.xlu0 %692 }
 0x1bb   : > { %v681_v16 = vpop.permute.xlu2 %680 }
 0x1c0   : > { %v695_v57 = vpop.permute.xlu1 %694 }
 0x1c1   : > { %v733_v9 = vsel %vm406_vm0, %v695_v57, %v697_v56 }
 0x1c2   : > { %v723_v58 = vpop.permute.xlu0 %722 }
 0x1c3   : > { %v744_v48 = vsel %vm406_vm0, %v721_v30, %v723_v58  ;;  %v683_v29 = vpop.permute.xlu2 %682 }
 0x1c4   : > { %v776_v42 = vsel %vm765_vm13, %v744_v48, 0  ;;  %v728_v47 = vsel %vm406_vm0, %v681_v16, %v683_v29 }
 0x1c5   : > { %820 = vmatpush.bf16.msra.mxu3 %v776_v42 }
 0x1c8   : > { %v719_v44 = vpop.permute.xlu1 %718 }
 0x1c9   : > { %v742_v49 = vsel %vm406_vm0, %v717_v50, %v719_v44  ;;  %v743_v59 = vsel %vm406_vm0, %v719_v44, %v721_v30 }
 0x1ca   : > { %v770_v62 = vsel %vm765_vm13, %v742_v49, 0  ;;  %v773_v2 = vsel %vm765_vm13, %v743_v59, 0 }
 0x1cb   : > { %794 = vmatpush.bf16.msra.mxu1 %v770_v62  ;;  %807 = vmatpush.bf16.msra.mxu2 %v773_v2  ;;  %v709_v60 = vpop.permute.xlu0 %708 }
 0x1d0   : > { %v711_v5 = vpop.permute.xlu1 %710 }
 0x1d1   : > { %v739_v4 = vsel %vm406_vm0, %v709_v60, %v711_v5  ;;  %v740_v13 = vsel %vm406_vm0, %v711_v5, %v713_v53 }
 0x1d2   : > { %808 = vmatpush.bf16.msra.mxu2 %v739_v4  ;;  %821 = vmatpush.bf16.msra.mxu3 %v740_v13 }
 0x1d3   : > { %v699_v63 = vpop.permute.xlu0 %698 }
 0x1d4   : > { %v734_v43 = vsel %vm406_vm0, %v697_v56, %v699_v63 }
 0x1d8   : > { %v701_v1 = vpop.permute.xlu1 %700 }
 0x1d9   : > { %v735_v36 = vsel %vm406_vm0, %v699_v63, %v701_v1 }
 0x1da   : > { %809 = vmatpush.bf16.msra.mxu2 %v735_v36 }
 0x1db   : > { %v707_v37 = vpop.permute.xlu0 %706 }
 0x1dc   : > { %v737_v17 = vsel %vm406_vm0, %v705_v6, %v707_v37  ;;  %v738_v18 = vsel %vm406_vm0, %v707_v37, %v709_v60 }
 0x1dd   : > { %782 = vmatpush.bf16.msra.mxu0 %v737_v17  ;;  %795 = vmatpush.bf16.msra.mxu1 %v738_v18 }
 0x1e0   : > { %v703_v20 = vpop.permute.xlu1 %702 }
 0x1e1   : > { %783 = vmatpush.bf16.msra.mxu0 %v733_v9  ;;  %796 = vmatpush.bf16.msra.mxu1 %v734_v43  ;;  %v736_v38 = vsel %vm406_vm0, %v701_v1, %v703_v20 }
 0x1e2   : > { %822 = vmatpush.bf16.msra.mxu3 %v736_v38 }
 0x1e3   : > { %v691_v33 = vpop.permute.xlu0 %690  ;;  %v647_v27 = vpop.permute.xlu2 %646 }
 0x1e4   : > { %v731_v34 = vsel %vm406_vm0, %v689_v61, %v691_v33  ;;  %v732_v0 = vsel %vm406_vm0, %v691_v33, %v693_v26 }
 0x1e5   : > { %810 = vmatpush.bf16.msra.mxu2 %v731_v34 }
 0x1e6   : > { %823 = vmatpush.bf16.msra.mxu3 %v732_v0 }
 0x1e8   : > { %v679_v40 = vpop.permute.xlu1 %678 }
 0x1e9   : > { %v727_v21 = vsel %vm406_vm0, %v679_v40, %v681_v16 }
 0x1ea   : > { %811 = vmatpush.bf16.msra.mxu2 %v727_v21  ;;  %824 = vmatpush.bf16.msra.mxu3 %v728_v47 }
 0x1eb   : > { %v685_v22 = vpop.permute.xlu0 %684 }
 0x1ed   : > { %1028 = vmatmul.msk.bf16.vlgmr.msra.gmra.mxu2 %vm761_vm14, %v640_v12  ;;  %1029 = vmatmul.msk.bf16.vlgmr.msra.gmra.mxu3 %vm761_vm14, %v640_v12 }
 0x1f0   : > { %v687_v23 = vpop.permute.xlu1 %686 }
 0x1f1   : > { %v729_v24 = vsel %vm406_vm0, %v685_v22, %v687_v23  ;;  %v730_v10 = vsel %vm406_vm0, %v687_v23, %v689_v61  ;;  %v1172_v22 = vld [vmem:[#allocation2 + $0x18] sm:$0xff] }
 0x1f2   : > { %784 = vmatpush.bf16.msra.mxu0 %v729_v24  ;;  %797 = vmatpush.bf16.msra.mxu1 %v730_v10 }
 0x1f3   : > { %v675_v7 = vpop.permute.xlu0 %674 }
 0x1f8   : > { %v677_v14 = vpop.permute.xlu1 %676 }
 0x1f9   : > { %v725_v41 = vsel %vm406_vm0, %v675_v7, %v677_v14  ;;  %v726_v25 = vsel %vm406_vm0, %v677_v14, %v679_v40 }
 0x1fa   : > { %785 = vmatpush.bf16.msra.mxu0 %v725_v41  ;;  %798 = vmatpush.bf16.msra.mxu1 %v726_v25 }
 0x1fd   : > { %1026 = vmatmul.msk.bf16.vlgmr.msra.gmra.mxu0 %vm761_vm14, %v640_v12  ;;  %1027 = vmatmul.msk.bf16.vlgmr.msra.gmra.mxu1 %vm761_vm14, %v640_v12 }
 0x270   : > { %v813_v54 = vpop.f32.mrf.mxu2  ;;  %v826_v11 = vpop.f32.mrf.mxu3 }
 0x271   : > { %v1634_v45 = vadd.f32 %v813_v54, %v647_v27  ;;  %v1636_v28 = vadd.f32 %v826_v11, %v647_v27 }
 0x273   : > { %v1032_v31 = vmul.f32 -1.442695, %v1634_v45  ;;  %v1033_v32 = vmul.f32 -1.442695, %v1636_v28 }
 0x275   : > { %1151 = vpow2.f32 %v1032_v31 }
 0x276   : > { %1153 = vpow2.f32 %v1033_v32 }
 0x278   : > { %v815_v3 = vpop.f32.mrf.mxu2  ;;  %v828_v15 = vpop.f32.mrf.mxu3 }
 0x27a   : > { %v787_v35 = vpop.f32.mrf.mxu0  ;;  %v800_v39 = vpop.f32.mrf.mxu1 }
 0x27b   : > { %v1152_v6 = vpop.eup %1151  ;;  %v1640_v46 = vadd.f32 %v787_v35, %v647_v27  ;;  %v1642_v30 = vadd.f32 %v800_v39, %v647_v27 }
 0x27c   : > { %v1154_v8 = vpop.eup %1153  ;;  %v844_v50 = vadd.f32 1.0, %v1152_v6 }
 0x27d   : > { %v1644_v51 = vadd.f32 1.0, %v1154_v8  ;;  %v1030_v52 = vmul.f32 -1.442695, %v1640_v46  ;;  %v1031_v26 = vmul.f32 -1.442695, %v1642_v30 }
 0x27e   : > { %1155 = vrcp.f32 %v844_v50  ;;  %v885_v4 = vand.u32 2147483647, %v844_v50  ;;  %vm881_vm15 = vweird.f32 %v844_v50  ;;  %v887_v1 = vand.u32 2147483648, %v844_v50 }
 0x27f   : > { %1157 = vrcp.f32 %v1644_v51  ;;  %vm896_vm1 = vweird.f32 %v1644_v51  ;;  %v900_v18 = vand.u32 2147483647, %v1644_v51  ;;  %v902_v19 = vand.u32 2147483648, %v1644_v51 }
 0x280   : > { %1159 = vpow2.f32 %v1030_v52  ;;  %vm1651_vm2 = vcmp.eq.f32.partialorder %v885_v4, 8.507059e+37  ;;  %v888_v12 = vor.u32 1.1754944e-38, %v887_v1 }
 0x281   : > { %1161 = vpow2.f32 %v1031_v26  ;;  %v903_v23 = vor.u32 1.1754944e-38, %v902_v19  ;;  %vm901_vm13 = vcmp.eq.f32.partialorder %v900_v18, 8.507059e+37 }
 0x282   : > { %v789_v53 = vpop.f32.mrf.mxu0  ;;  %v802_v57 = vpop.f32.mrf.mxu1 }
 0x284   : > { %v1156_v58 = vpop.eup %1155 }
 0x285   : > { %v1158_v48 = vpop.eup %1157  ;;  %v877_v42 = vmul.f32 %v1156_v58, %v844_v50  ;;  %vm882_vm0 = vweird.f32 %v1156_v58 }
 0x286   : > { %v1160_v44 = vpop.eup %1159  ;;  %v892_v59 = vmul.f32 %v1158_v48, %v1644_v51  ;;  %vm897_vm3 = vweird.f32 %v1158_v48  ;;  %vm1658_vm4 = vmor %vm881_vm15, %vm882_vm0 }
 0x287   : > { %v1162_v49 = vpop.eup %1161  ;;  %v842_v61 = vadd.f32 1.0, %v1160_v44  ;;  %v878_v2 = vsub.f32 1.0, %v877_v42  ;;  %vm1666_vm7 = vmor %vm896_vm1, %vm897_vm3  ;;  %v1197_v42 = vmov 2  }
 0x288   : > { %v843_v62 = vadd.f32 1.0, %v1162_v49  ;;  %v893_v60 = vsub.f32 1.0, %v892_v59  ;;  %1150 = vset.pattern.permute.xlu0 %v1197_v42 }
 0x289   : > { %1163 = vrcp.f32 %v842_v61  ;;  %v879_v5 = vmul.f32 %v1156_v58, %v878_v2  ;;  %v857_v43 = vand.u32 2147483648, %v842_v61  ;;  %v855_v0 = vand.u32 2147483647, %v842_v61 }
 0x28a   : > { %1165 = vrcp.f32 %v843_v62  ;;  %v894_v63 = vmul.f32 %v1158_v48, %v893_v60  ;;  %v872_v29 = vand.u32 2147483648, %v843_v62  ;;  %v870_v47 = vand.u32 2147483647, %v843_v62 }
 0x28b   : > { %v880_v37 = vadd.f32 %v1156_v58, %v879_v5  ;;  %vm851_vm8 = vweird.f32 %v842_v61  ;;  %v858_v7 = vor.u32 1.1754944e-38, %v857_v43  ;;  %vm866_vm10 = vweird.f32 %v843_v62 }
 0x28c   : > { %v895_v9 = vadd.f32 %v1158_v48, %v894_v63  ;;  %vm856_vm11 = vcmp.eq.f32.partialorder %v855_v0, 8.507059e+37  ;;  %v873_v27 = vor.u32 1.1754944e-38, %v872_v29  ;;  %vm871_vm14 = vcmp.eq.f32.partialorder %v870_v47, 8.507059e+37  ;;  %v1169_v29 = vld [vmem:[#allocation2 + $0x28] sm:$0xff] }
 0x28d   : > { %v884_v40 = vsel %vm1658_vm4, %v1156_v58, %v880_v37 }
 0x28e   : > { %v899_v10 = vsel %vm1666_vm7, %v1158_v48, %v895_v9  ;;  %v889_v41 = vsel %vm1651_vm2, %v888_v12, %v884_v40  ;;  %v1171_v12 = vld [vmem:[#allocation2 + $0x10] sm:$0xff] }
 0x28f   : > { %v1164_v13 = vpop.eup %1163  ;;  %v904_v31 = vsel %vm901_vm13, %v903_v23, %v899_v10  ;;  %v908_v15 = vmul.f32 %v889_v41, %v1634_v45 }
 0x290   : > { %v1166_v56 = vpop.eup %1165  ;;  %v847_v36 = vmul.f32 %v1164_v13, %v842_v61  ;;  %vm852_vm5 = vweird.f32 %v1164_v13  ;;  %v909_v6 = vmul.f32 %v904_v31, %v1636_v28 }
 0x291   : > { %v862_v16 = vmul.f32 %v1166_v56, %v843_v62  ;;  %vm867_vm6 = vweird.f32 %v1166_v56  ;;  %vm853_vm9 = vmor %vm851_vm8, %vm852_vm5  ;;  %v917_v52 = vmul.f32 %v908_v15, %v908_v15 }
 0x292   : > { %v848_v20 = vsub.f32 1.0, %v847_v36  ;;  %vm868_vm12 = vmor %vm866_vm10, %vm867_vm6  ;;  %v918_v57 = vmul.f32 %v909_v6, %v909_v6 }
 0x293   : > { %v863_v38 = vsub.f32 1.0, %v862_v16 }
 0x294   : > { %v849_v34 = vmul.f32 %v1164_v13, %v848_v20 }
 0x295   : > { %v864_v21 = vmul.f32 %v1166_v56, %v863_v38 }
 0x296   : > { %v850_v24 = vadd.f32 %v1164_v13, %v849_v34 }
 0x297   : > { %v865_v14 = vadd.f32 %v1166_v56, %v864_v21  ;;  %v1170_v21 = vld [vmem:[#allocation2] sm:$0xff] }
 0x298   : > { %v854_v25 = vsel %vm853_vm9, %v1164_v13, %v850_v24 }
 0x299   : > { %v859_v54 = vsel %vm856_vm11, %v858_v7, %v854_v25  ;;  %v869_v11 = vsel %vm868_vm12, %v1166_v56, %v865_v14 }
 0x29a   : > { %v906_v32 = vmul.f32 %v859_v54, %v1640_v46  ;;  %v874_v3 = vsel %vm871_vm14, %v873_v27, %v869_v11  ;;  %v1196_v46 = vmov 1  }
 0x29b   : > { %v907_v35 = vmul.f32 %v874_v3, %v1642_v30  ;;  %1148 = vset.pattern.permute.xlu2 %v1196_v46 }
 0x29c   : > { %v915_v39 = vmul.f32 %v906_v32, %v906_v32 }
 0x29d   : > { %v916_v8 = vmul.f32 %v907_v35, %v907_v35  ;;  %v910_v50 = vadd.f32 %v907_v35, %v906_v32 }
 0x29f   : > { %v911_v51 = vadd.f32 %v910_v50, %v908_v15  ;;  %v919_v26 = vadd.f32 %v916_v8, %v915_v39 }
 0x2a1   : > { %v912_v53 = vadd.f32 %v911_v51, %v909_v6  ;;  %v920_v58 = vadd.f32 %v919_v26, %v917_v52 }
 0x2a3   : > { %913 = vadd.xlane.f32.xlu0 %v912_v53  ;;  %v921_v48 = vadd.f32 %v920_v58, %v918_v57 }
 0x2a5   : > { %922 = vadd.xlane.f32.xlu1 %v921_v48 }
 0x316   : > { %v914_v45 = vpop.xlane.xlu0 %913 }
 0x317   : > { %v924_v30 = vmul.f32 0.001953125, %v914_v45 }
 0x318   : > { %v923_v44 = vpop.xlane.xlu1 %922 }
 0x319   : > { %v925_v49 = vmul.f32 0.001953125, %v923_v44  ;;  %v926_v28 = vmul.f32 %v924_v30, %v924_v30  ;;  %v940_v36 = vsub.f32 %v906_v32, %v924_v30  ;;  %v941_v37 = vsub.f32 %v907_v35, %v924_v30 }
 0x31a   : > { %v942_v16 = vsub.f32 %v908_v15, %v924_v30  ;;  %v943_v17 = vsub.f32 %v909_v6, %v924_v30 }
 0x31b   : > { %v927_v59 = vsub.f32 %v925_v49, %v926_v28 }
 0x31d   : > { %v928_v61 = vadd.f32 1e-05, %v927_v59 }
 0x31f   : > { %1167 = vrsqrt.f32 %v928_v61  ;;  %vm935_vm0 = vweird.f32 %v928_v61 }
 0x325   : > { %v1168_v62 = vpop.eup %1167 }
 0x326   : > { %v930_v2 = vmul.f32 %v1168_v62, %v928_v61  ;;  %vm936_vm15 = vweird.f32 %v1168_v62 }
 0x327   : > { %vm937_vm1 = vmor %vm935_vm0, %vm936_vm15 }
 0x328   : > { %v931_v60 = vmul.f32 %v1168_v62, %v930_v2 }
 0x32a   : > { %v932_v5 = vmul.f32 0.5, %v931_v60 }
 0x32c   : > { %v933_v4 = vsub.f32 1.5, %v932_v5 }
 0x32e   : > { %v934_v13 = vmul.f32 %v1168_v62, %v933_v4 }
 0x330   : > { %v938_v63 = vsel %vm937_vm1, %v1168_v62, %v934_v13 }
 0x331   : > { %v939_v56 = vmul.f32 %v938_v63, %v1612_v55 }
 0x333   : > { %946 = vperm.xlu2 %1148, %v939_v56  }
 0x33b   : > { %1149 = vset.pattern.permute.xlu2 %v1197_v42 }
 0x33c   : > { %954 = vperm.xlu2 %1149, %v1612_v55  }
 0x38d   : > { %v947_v1 = vpop.permute.xlu2 %946 }
 0x38e   : > { %v949_v18 = vmul.f32 %v947_v1, %v940_v36  ;;  %v950_v19 = vmul.f32 %v947_v1, %v941_v37  ;;  %v951_v20 = vmul.f32 %v947_v1, %v942_v16  ;;  %v952_v9 = vmul.f32 %v947_v1, %v943_v17 }
 0x395   : > { %968 = sbr.rel (%p1034_p4) target bundleno = 927 (0x39f), region = 44 }
 0x396   : > { %v955_v43 = vpop.permute.xlu2 %954 }
 0x397   : > { %v957_v38 = vadd.f32 %v955_v43, %v949_v18  ;;  %v958_v33 = vadd.f32 %v955_v43, %v950_v19  ;;  %v959_v34 = vadd.f32 %v955_v43, %v951_v20  ;;  %v960_v0 = vadd.f32 %v955_v43, %v952_v9 }
 0x399   : > { %v961_v40 = vadd.f32 %v1169_v29, %v957_v38  ;;  %v962_v47 = vadd.f32 %v1170_v21, %v958_v33  ;;  %v963_v55 = vadd.f32 %v1171_v12, %v959_v34  ;;  %v964_v23 = vadd.f32 %v1172_v22, %v960_v0 }
 0x39b   : > { %969 = vst [vmem:[#allocation2 + $0x28] sm:$0xff] %v961_v40 }
 0x39c   : > { %970 = vst [vmem:[#allocation2] sm:$0xff] %v962_v47 }
 0x39d   : > { %971 = vst [vmem:[#allocation2 + $0x10] sm:$0xff] %v963_v55 }
 0x39e   : > { %972 = vst [vmem:[#allocation2 + $0x18] sm:$0xff] %v964_v23 }
 0x39f PF: > { %p1035_p5 = scmp.ne.s32.totalorder %s1229_s16, 3 }
 0x3a1   : > { %976 = sbr.rel (%p1035_p5) target bundleno = 941 (0x3ad), region = 48 }
 0x3a6   : > { %v977_v24 = vld [vmem:[%s1710_s0] sm:$0xff]  ;;  %v978_v10 = vld [vmem:[%s1710_s0 + $0x8] sm:$0xff]  ;;  %v1036_v7 = vld [vmem:[%s1710_s0 + $0x10] sm:$0xff] }
 0x3a7   : > { %v979_v14 = vadd.f32 %v977_v24, %v961_v40  ;;  %v980_v41 = vadd.f32 %v978_v10, %v962_v47  ;;  %v986_v25 = vadd.f32 %v1036_v7, %v963_v55  ;;  %v1037_v27 = vld [vmem:[%s1710_s0 + $0x18] sm:$0xff] }
 0x3a8   : > { %v987_v54 = vadd.f32 %v1037_v27, %v964_v23 }
 0x3a9   : > { %981 = vst [vmem:[%s1714_s4] sm:$0xff] %v979_v14 }
 0x3aa   : > { %982 = vst [vmem:[%s1714_s4 + $0x8] sm:$0xff] %v980_v41 }
 0x3ab   : > { %1038 = vst [vmem:[%s1714_s4 + $0x10] sm:$0xff] %v986_v25 }
 0x3ac   : > { %1039 = vst [vmem:[%s1714_s4 + $0x18] sm:$0xff] %v987_v54 }
 0x3ad PF: > { %s14_s15 = sadd.s32 1, %s1179_s15  }
 0x3ae   : > { %p11_p6 = scmp.ge.s32.totalorder %s14_s15, 6  }
 0x3b0   :  { %13 = sbr.rel (!%p11_p6) target bundleno = 1 (0x1), region = 83 }

</bundles_post_ra>
